<compile_context>
chip_gen: v6e
topology: v6e:2x2x1
jax: 0.10.0
libtpu: 0.0.40
codegen_flags: <defaults>
</compile_context>

<pallas_src>
import math
from typing import NamedTuple

import jax
import jax.numpy as jnp
from jax.experimental import pallas as pl
from jax.experimental.pallas import tpu as pltpu

LANE = 128
SUBLANE = 8


def _round_up(x: int, m: int) -> int:
    return (x + m - 1) // m * m


def _vmem_budget_bytes() -> int:
    """~75% of the per-TensorCore VMEM, leaving headroom for Mosaic scratch."""
    cap = 64 * 1024 * 1024  # conservative fallback (v7x per-TC capacity)
    try:
        cap = int(pltpu.get_tpu_info().vmem_capacity_bytes)
    except Exception:
        pass
    return (cap * 3) // 4


def _vmem_need_bytes(tm, tk, dim_pad, c_pad, t_bufs=2) -> int:
    """Conservative VMEM accounting for the fused kernel's buffers."""
    return (2 * tm * tk * 2                # x tiles (bf16, double-buffered)
            + 2 * tk * dim_pad * 2         # W_enc tiles (bf16, double-buffered)
            + t_bufs * dim_pad * c_pad * 2 # txt_feas (bf16, resident)
            + 2 * tm * c_pad * 4           # output tiles (f32, double-buffered)
            + tm * dim_pad * 4)            # feature accumulator (f32 scratch)


class ClipZeroShotParams(NamedTuple):
    w: jax.Array        # (K_pad, dim_pad) bf16, pre-padded at init
    t: jax.Array        # (dim_pad, C_pad) bf16, pre-padded at init
    K: int
    K_pad: int
    tk: int
    dim: int
    dim_pad: int
    num_classes: int
    C_pad: int
    vmem_budget: int


def prepare_clip_zero_shot(w_enc, txt_feas, *, tk_target=2048) -> ClipZeroShotParams:
    """One-time (model-init) preparation: cast/pad weights, pick static tiling.

    w_enc:    (K, dim)             synthetic linear encoder weight
    txt_feas: (dim, num_classes)   zero-shot text features (columns = classes)
    """
    K, dim = int(w_enc.shape[0]), int(w_enc.shape[1])
    dim_t, num_classes = int(txt_feas.shape[0]), int(txt_feas.shape[1])
    assert dim_t == dim

    # dim padding: lane multiple; bump to the 256-wide v6e/v7x MXU only when
    # the extra HBM traffic on W_enc is small (<=12.5%).  Realistic CLIP dims
    # (512/768/1024) are already 256-aligned.
    dim_pad = _round_up(dim, LANE)
    if dim_pad % 256 != 0:
        dim_pad_256 = _round_up(dim, 256)
        if (dim_pad_256 - dim) * 8 <= dim:
            dim_pad = dim_pad_256
    C_pad = _round_up(num_classes, LANE)   # lane-dense, unmasked output stores

    # K tiling: prefer a lane-multiple tk that divides K exactly so the
    # per-call x pad is a no-op and W_enc carries no padding traffic.
    K_128 = _round_up(K, LANE)
    if K_128 <= tk_target:
        tk, K_pad = K_128, K_128
    else:
        tk = 0
        for cand in range(tk_target - tk_target % LANE, LANE - 1, -LANE):
            if K % cand == 0:
                tk = cand
                break
        if tk == 0:
            tk = tk_target - tk_target % LANE
        K_pad = _round_up(K, tk)

    vmem_budget = _vmem_budget_bytes()
    # Shrink tk if even a minimal-tm configuration would not fit (huge dim / C
    # on v7x's 64 MiB VMEM).
    while tk > LANE and _vmem_need_bytes(SUBLANE, tk, dim_pad, C_pad) > vmem_budget:
        tk = max(LANE, _round_up(tk // 2, LANE))
        K_pad = _round_up(K, tk)

    # Cast + pad ONCE here (hoisted off the per-call path).  Zero padding keeps
    # the math exact: padded K rows contribute 0 to features, padded dim rows of
    # txt_feas are 0, padded class columns are sliced off in the forward.
    w = w_enc.astype(jnp.bfloat16)
    t = txt_feas.astype(jnp.bfloat16)
    if (K_pad, dim_pad) != (K, dim):
        w = jnp.pad(w, ((0, K_pad - K), (0, dim_pad - dim)))
    if (dim_pad, C_pad) != (dim, num_classes):
        t = jnp.pad(t, ((0, dim_pad - dim), (0, C_pad - num_classes)))
    w = jax.block_until_ready(w)
    t = jax.block_until_ready(t)

    return ClipZeroShotParams(w, t, K, K_pad, tk, dim, dim_pad,
                              num_classes, C_pad, vmem_budget)


def _clip_zs_kernel(x_ref, w_ref, t_ref, o_ref, acc_ref):
    """One (tm, tk) step of the fused encoder + L2-norm + classifier pipeline.

    x_ref:   (tm, tk)         bf16   image-pixel tile
    w_ref:   (tk, dim_pad)    bf16   encoder-weight K-tile
    t_ref:   (dim_pad, C_pad) bf16   zero-shot text features (VMEM resident)
    o_ref:   (tm, C_pad)      f32    logits tile (lane-dense)
    acc_ref: (tm, dim_pad)    f32    persistent feature accumulator
    """
    k = pl.program_id(1)

    @pl.when(k == 0)
    def _init():
        acc_ref[...] = jnp.zeros_like(acc_ref)

    # Encoder matmul: stream W_enc over K, accumulate features in f32 on MXU.
    acc_ref[...] += jnp.dot(
        x_ref[...], w_ref[...], preferred_element_type=jnp.float32
    )

    @pl.when(k == pl.num_programs(1) - 1)
    def _finalize():
        f = acc_ref[...]                                   # (tm, dim_pad) f32
        sumsq = jnp.sum(f * f, axis=-1, keepdims=True)     # exact, f32
        # rsqrt goes to the EUP slot; eps guards zero (batch-padding) rows.
        inv_norm = jax.lax.rsqrt(jnp.maximum(sumsq, jnp.float32(1e-30)))
        # Classifier matmul: bf16 x bf16 inputs, f32 accumulation (MXU-native).
        logits = jnp.dot(f.astype(jnp.bfloat16), t_ref[...],
                         preferred_element_type=jnp.float32)
        # Fused L2 normalization:  (f/||f||) @ T == (f @ T) * rsqrt(sum f^2)
        o_ref[...] = logits * inv_norm


def _build_forward(params: ClipZeroShotParams, tm, grid, single_buffer_t):
    dim_pad, C_pad, tk = params.dim_pad, params.C_pad, params.tk
    if single_buffer_t:
        # txt_feas has a constant block index and is never re-fetched; a single
        # buffer halves its resident VMEM footprint (matters for large heads on
        # v7x's 64 MiB VMEM).
        t_spec = pl.BlockSpec((dim_pad, C_pad), lambda i, k: (0, 0),
                              pipeline_mode=pl.Buffered(1))
    else:
        t_spec = pl.BlockSpec((dim_pad, C_pad), lambda i, k: (0, 0))
    B_pad = grid[0] * tm
    # NOTE: pl.Buffered(3) on the W_enc spec is worth sweeping if a trace shows
    # exposed DMA between K steps; left at the default depth here.
    return pl.pallas_call(
        _clip_zs_kernel,
        out_shape=jax.ShapeDtypeStruct((B_pad, C_pad), jnp.float32),
        grid_spec=pltpu.PrefetchScalarGridSpec(
            num_scalar_prefetch=0,
            grid=grid,
            in_specs=[
                # x tile: depends on both grid axes.
                pl.BlockSpec((tm, tk), lambda i, k: (i, k)),
                # W_enc K-tile: streamed once per B-tile (dominant HBM traffic).
                pl.BlockSpec((tk, dim_pad), lambda i, k: (k, 0)),
                # txt_feas: constant block index -> stays resident in VMEM.
                t_spec,
            ],
            # Same output block across the K axis -> output-resident epilogue.
            out_specs=pl.BlockSpec((tm, C_pad), lambda i, k: (i, 0)),
            scratch_shapes=[pltpu.VMEM((tm, dim_pad), jnp.float32)],
        ),
        compiler_params=pltpu.CompilerParams(
            dimension_semantics=("parallel", "arbitrary"),
            vmem_limit_bytes=params.vmem_budget,
        ),
    )


def clip_zero_shot_forward(x_nchw, params: ClipZeroShotParams):
    """out = normalize(flatten(x) @ W_enc) @ txt_feas, one fused Pallas kernel.

    x_nchw: (B, C, H, W) float;  returns (B, num_classes) float32 logits.
    """
    B = int(x_nchw.shape[0])
    K = int(math.prod(x_nchw.shape[1:]))
    assert K == params.K

    # --- batch tile sizing ---------------------------------------------------
    # Maximize tm so W_enc is re-streamed as few times as possible; cap against
    # the per-generation VMEM budget.
    B_pad = _round_up(B, SUBLANE)
    tm = B_pad if B_pad <= 512 else 512
    while tm > SUBLANE and _vmem_need_bytes(
            tm, params.tk, params.dim_pad, params.C_pad) > params.vmem_budget:
        tm = max(SUBLANE, _round_up(tm // 2, SUBLANE))
    B_pad = _round_up(B, tm)
    grid = (B_pad // tm, params.K_pad // params.tk)
    # NOTE: on v7x the 2nd TensorCore idles when grid[0] == 1; large tm is
    # still preferred here because the kernel is HBM-bound on the W_enc stream.

    # --- per-call glue: flatten NCHW, cast to bf16; pad only if actually needed
    x = x_nchw.reshape(B, K).astype(jnp.bfloat16)
    if (B_pad, params.K_pad) != (B, K):
        x = jnp.pad(x, ((0, B_pad - B), (0, params.K_pad - K)))

    try:
        out = _build_forward(params, tm, grid, single_buffer_t=True)(
            x, params.w, params.t)
    except Exception:
        # Fallback for JAX builds without BlockSpec(pipeline_mode=...): default
        # double-buffered txt_feas (identical math, slightly more VMEM).
        out = _build_forward(params, tm, grid, single_buffer_t=False)(
            x, params.w, params.t)

    return out[:B, :params.num_classes]


def _reference_forward(x_nchw, w_enc, txt_feas):
    """Pure-JAX reference of the same forward pass (bf16 encoder inputs, f32
    classifier, matching torch's .float() semantics)."""
    B = x_nchw.shape[0]
    x = x_nchw.reshape(B, -1).astype(jnp.bfloat16)
    f = jnp.dot(x, w_enc.astype(jnp.bfloat16), preferred_element_type=jnp.float32)
    f = f / jnp.linalg.norm(f, axis=-1, keepdims=True)
    return f @ txt_feas.astype(jnp.float32)


if __name__ == "__main__":
    # Small shapes consistent with the module's forward: NCHW images, a
    # synthetic linear encoder to `dim`, and a (dim, num_classes) zero-shot
    # text-feature matrix (columns L2-normalized, like CLIP).
    B, C, H, W = 2, 4, 16, 16
    dim, num_classes = 64, 10

    key = jax.random.PRNGKey(0)
    k_x, k_w, k_t = jax.random.split(key, 3)

    x1 = jax.random.normal(k_x, (B, C, H, W), dtype=jnp.float32)
    w_enc = 0.02 * jax.random.normal(k_w, (C * H * W, dim), dtype=jnp.float32)
    txt_feas = jax.random.normal(k_t, (dim, num_classes), dtype=jnp.float32)
    txt_feas = txt_feas / jnp.linalg.norm(txt_feas, axis=0, keepdims=True)

    # One-time (model-init) weight preparation: cast/pad hoisted off the
    # per-call path.
    params = prepare_clip_zero_shot(w_enc, txt_feas)

    out = jax.block_until_ready(clip_zero_shot_forward(x1, params))
    ref = jax.block_until_ready(_reference_forward(x1, w_enc, txt_feas))

    assert out.shape == (B, num_classes), out.shape
    assert bool(jnp.all(jnp.isfinite(out)))
    max_err = float(jnp.max(jnp.abs(out - ref)))
    assert max_err < 1e-2, f"max abs error vs reference: {max_err}"

    print("KERNEL_OK")
</pallas_src>

<mosaic_0001>
module attributes {stable_mosaic.version = 11 : i64} {
  func.func @_clip_zs_kernel(%arg0: i32, %arg1: i32, %arg2: memref<8x1024xbf16, #tpu.memory_space<vmem>>, %arg3: memref<1024x128xbf16, #tpu.memory_space<vmem>>, %arg4: memref<128x128xbf16, #tpu.memory_space<vmem>>, %arg5: memref<8x128xf32, #tpu.memory_space<vmem>>, %arg6: memref<8x128xf32, #tpu.memory_space<vmem>>) attributes {dimension_semantics = [#tpu.dimension_semantics<parallel>, #tpu.dimension_semantics<arbitrary>], iteration_bounds = array<i64: 1, 1>, scalar_prefetch = 0 : i64, scratch_operands = 1 : i64, tpu.core_type = #tpu.core_type<tc>, window_params = [{transform_indices = @transform_0, window_bounds = array<i64: 8, 1024>}, {transform_indices = @transform_1, window_bounds = array<i64: 1024, 128>}, {pipeline_mode = #tpu.pipeline_mode<synchronous>, transform_indices = @transform_2, window_bounds = array<i64: 128, 128>}, {transform_indices = @transform_3, window_bounds = array<i64: 8, 128>}]} {
    %c0_i32 = arith.constant 0 : i32
    %0 = arith.cmpi eq, %arg1, %c0_i32 : i32
    %1 = arith.extui %0 : i1 to i32
    %c0_i32_0 = arith.constant 0 : i32
    %2 = arith.cmpi ne, %1, %c0_i32_0 : i32
    scf.if %2 {
      %cst_10 = arith.constant 0.000000e+00 : f32
      %12 = vector.broadcast %cst_10 : f32 to vector<8x128xf32>
      %c0_11 = arith.constant 0 : index
      %c0_12 = arith.constant 0 : index
      %13 = vector.load %arg6[%c0_11, %c0_12] : memref<8x128xf32, #tpu.memory_space<vmem>>, vector<8x128xf32>
      tpu.vector_store %arg6[%c0_11, %c0_12], %12 {strides = array<i32>} : memref<8x128xf32, #tpu.memory_space<vmem>>, vector<8x128xf32>,
    } else {
    }
    %c0 = arith.constant 0 : index
    %c0_1 = arith.constant 0 : index
    %3 = vector.load %arg6[%c0, %c0_1] : memref<8x128xf32, #tpu.memory_space<vmem>>, vector<8x128xf32>
    %c0_2 = arith.constant 0 : index
    %c0_3 = arith.constant 0 : index
    %4 = vector.load %arg2[%c0_2, %c0_3] : memref<8x1024xbf16, #tpu.memory_space<vmem>>, vector<8x1024xbf16>
    %c0_4 = arith.constant 0 : index
    %c0_5 = arith.constant 0 : index
    %5 = vector.load %arg3[%c0_4, %c0_5] : memref<1024x128xbf16, #tpu.memory_space<vmem>>, vector<1024x128xbf16>
    %cst = arith.constant dense<0.000000e+00> : vector<8x128xf32>
    %6 = tpu.matmul %4, %5, %cst {dimension_numbers = #tpu.dot_dimension_numbers<[1], [0], [0], [1], [0, 0, 1, 1], [], []>} : vector<8x1024xbf16>, vector<1024x128xbf16>, vector<8x128xf32> -> vector<8x128xf32>
    %7 = arith.addf %3, %6 : vector<8x128xf32>
    %c0_6 = arith.constant 0 : index
    %c0_7 = arith.constant 0 : index
    %8 = vector.load %arg6[%c0_6, %c0_7] : memref<8x128xf32, #tpu.memory_space<vmem>>, vector<8x128xf32>
    tpu.vector_store %arg6[%c0_6, %c0_7], %7 {strides = array<i32>} : memref<8x128xf32, #tpu.memory_space<vmem>>, vector<8x128xf32>,
    %c0_i32_8 = arith.constant 0 : i32
    %9 = arith.cmpi eq, %arg1, %c0_i32_8 : i32
    %10 = arith.extui %9 : i1 to i32
    %c0_i32_9 = arith.constant 0 : i32
    %11 = arith.cmpi ne, %10, %c0_i32_9 : i32
    scf.if %11 {
      %c0_10 = arith.constant 0 : index
      %c0_11 = arith.constant 0 : index
      %12 = vector.load %arg6[%c0_10, %c0_11] : memref<8x128xf32, #tpu.memory_space<vmem>>, vector<8x128xf32>
      %13 = arith.mulf %12, %12 : vector<8x128xf32>
      %cst_12 = arith.constant dense<0.000000e+00> : vector<8xf32>
      %14 = vector.multi_reduction <add>, %13, %cst_12 [1] : vector<8x128xf32> to vector<8xf32>
      %15 = vector.shape_cast %14 : vector<8xf32> to vector<8x1xf32>
      %cst_13 = arith.constant 1.000000e-30 : f32
      %16 = vector.broadcast %cst_13 : f32 to vector<8x1xf32>
      %17 = arith.maximumf %15, %16 : vector<8x1xf32>
      %18 = math.rsqrt %17 : vector<8x1xf32>
      %19 = arith.truncf %12 : vector<8x128xf32> to vector<8x128xbf16>
      %c0_14 = arith.constant 0 : index
      %c0_15 = arith.constant 0 : index
      %20 = vector.load %arg4[%c0_14, %c0_15] : memref<128x128xbf16, #tpu.memory_space<vmem>>, vector<128x128xbf16>
      %cst_16 = arith.constant dense<0.000000e+00> : vector<8x128xf32>
      %21 = tpu.matmul %19, %20, %cst_16 {dimension_numbers = #tpu.dot_dimension_numbers<[1], [0], [0], [1], [0, 0, 1, 1], [], []>} : vector<8x128xbf16>, vector<128x128xbf16>, vector<8x128xf32> -> vector<8x128xf32>
      %22 = vector.broadcast %18 : vector<8x1xf32> to vector<8x128xf32>
      %23 = arith.mulf %21, %22 : vector<8x128xf32>
      %c0_17 = arith.constant 0 : index
      %c0_18 = arith.constant 0 : index
      %24 = vector.load %arg5[%c0_17, %c0_18] : memref<8x128xf32, #tpu.memory_space<vmem>>, vector<8x128xf32>
      tpu.vector_store %arg5[%c0_17, %c0_18], %23 {strides = array<i32>} : memref<8x128xf32, #tpu.memory_space<vmem>>, vector<8x128xf32>,
    } else {
    }
    return
  }
  func.func @transform_0(%arg0: i32, %arg1: i32) -> (i32, i32) {
    %c0_i32 = arith.constant 0 : i32
    return %arg0, %arg1 : i32, i32
  }
  func.func @transform_1(%arg0: i32, %arg1: i32) -> (i32, i32) {
    %c0_i32 = arith.constant 0 : i32
    %c0_i32_0 = arith.constant 0 : i32
    return %arg1, %c0_i32 : i32, i32
  }
  func.func @transform_2(%arg0: i32, %arg1: i32) -> (i32, i32) {
    %c0_i32 = arith.constant 0 : i32
    %c0_i32_0 = arith.constant 0 : i32
    %c0_i32_1 = arith.constant 0 : i32
    return %c0_i32, %c0_i32_0 : i32, i32
  }
  func.func @transform_3(%arg0: i32, %arg1: i32) -> (i32, i32) {
    %c0_i32 = arith.constant 0 : i32
    %c0_i32_0 = arith.constant 0 : i32
    return %arg0, %c0_i32 : i32, i32
  }
}

module attributes {stable_mosaic.version = 11 : i64} {
  func.func @_clip_zs_kernel(%arg0: i32, %arg1: i32, %arg2: memref<8x1024xbf16, #tpu.memory_space<vmem>>, %arg3: memref<1024x128xbf16, #tpu.memory_space<vmem>>, %arg4: memref<128x128xbf16, #tpu.memory_space<vmem>>, %arg5: memref<8x128xf32, #tpu.memory_space<vmem>>, %arg6: memref<8x128xf32, #tpu.memory_space<vmem>>) attributes {dimension_semantics = [#tpu.dimension_semantics<parallel>, #tpu.dimension_semantics<arbitrary>], iteration_bounds = array<i64: 1, 1>, scalar_prefetch = 0 : i64, scratch_operands = 1 : i64, tpu.core_type = #tpu.core_type<tc>, window_params = [{transform_indices = @transform_0, window_bounds = array<i64: 8, 1024>}, {transform_indices = @transform_1, window_bounds = array<i64: 1024, 128>}, {pipeline_mode = #tpu.pipeline_mode<synchronous>, transform_indices = @transform_2, window_bounds = array<i64: 128, 128>}, {transform_indices = @transform_3, window_bounds = array<i64: 8, 128>}]} {
    %c0_i32 = arith.constant 0 : i32
    %0 = arith.cmpi eq, %arg1, %c0_i32 : i32
    %1 = arith.extui %0 : i1 to i32
    %c0_i32_0 = arith.constant 0 : i32
    %2 = arith.cmpi ne, %1, %c0_i32_0 : i32
    scf.if %2 {
      %cst_10 = arith.constant 0.000000e+00 : f32
      %12 = vector.broadcast %cst_10 : f32 to vector<8x128xf32>
      %c0_11 = arith.constant 0 : index
      %c0_12 = arith.constant 0 : index
      %13 = vector.load %arg6[%c0_11, %c0_12] : memref<8x128xf32, #tpu.memory_space<vmem>>, vector<8x128xf32>
      tpu.vector_store %arg6[%c0_11, %c0_12], %12 {strides = array<i32>} : memref<8x128xf32, #tpu.memory_space<vmem>>, vector<8x128xf32>,
    } else {
    }
    %c0 = arith.constant 0 : index
    %c0_1 = arith.constant 0 : index
    %3 = vector.load %arg6[%c0, %c0_1] : memref<8x128xf32, #tpu.memory_space<vmem>>, vector<8x128xf32>
    %c0_2 = arith.constant 0 : index
    %c0_3 = arith.constant 0 : index
    %4 = vector.load %arg2[%c0_2, %c0_3] : memref<8x1024xbf16, #tpu.memory_space<vmem>>, vector<8x1024xbf16>
    %c0_4 = arith.constant 0 : index
    %c0_5 = arith.constant 0 : index
    %5 = vector.load %arg3[%c0_4, %c0_5] : memref<1024x128xbf16, #tpu.memory_space<vmem>>, vector<1024x128xbf16>
    %cst = arith.constant dense<0.000000e+00> : vector<8x128xf32>
    %6 = tpu.matmul %4, %5, %cst {dimension_numbers = #tpu.dot_dimension_numbers<[1], [0], [0], [1], [0, 0, 1, 1], [], []>} : vector<8x1024xbf16>, vector<1024x128xbf16>, vector<8x128xf32> -> vector<8x128xf32>
    %7 = arith.addf %3, %6 : vector<8x128xf32>
    %c0_6 = arith.constant 0 : index
    %c0_7 = arith.constant 0 : index
    %8 = vector.load %arg6[%c0_6, %c0_7] : memref<8x128xf32, #tpu.memory_space<vmem>>, vector<8x128xf32>
    tpu.vector_store %arg6[%c0_6, %c0_7], %7 {strides = array<i32>} : memref<8x128xf32, #tpu.memory_space<vmem>>, vector<8x128xf32>,
    %c0_i32_8 = arith.constant 0 : i32
    %9 = arith.cmpi eq, %arg1, %c0_i32_8 : i32
    %10 = arith.extui %9 : i1 to i32
    %c0_i32_9 = arith.constant 0 : i32
    %11 = arith.cmpi ne, %10, %c0_i32_9 : i32
    scf.if %11 {
      %c0_10 = arith.constant 0 : index
      %c0_11 = arith.constant 0 : index
      %12 = vector.load %arg6[%c0_10, %c0_11] : memref<8x128xf32, #tpu.memory_space<vmem>>, vector<8x128xf32>
      %13 = arith.mulf %12, %12 : vector<8x128xf32>
      %cst_12 = arith.constant dense<0.000000e+00> : vector<8xf32>
      %14 = vector.multi_reduction <add>, %13, %cst_12 [1] : vector<8x128xf32> to vector<8xf32>
      %15 = vector.shape_cast %14 : vector<8xf32> to vector<8x1xf32>
      %cst_13 = arith.constant 1.000000e-30 : f32
      %16 = vector.broadcast %cst_13 : f32 to vector<8x1xf32>
      %17 = arith.maximumf %15, %16 : vector<8x1xf32>
      %18 = math.rsqrt %17 : vector<8x1xf32>
      %19 = arith.truncf %12 : vector<8x128xf32> to vector<8x128xbf16>
      %c0_14 = arith.constant 0 : index
      %c0_15 = arith.constant 0 : index
      %20 = vector.load %arg4[%c0_14, %c0_15] : memref<128x128xbf16, #tpu.memory_space<vmem>>, vector<128x128xbf16>
      %cst_16 = arith.constant dense<0.000000e+00> : vector<8x128xf32>
      %21 = tpu.matmul %19, %20, %cst_16 {dimension_numbers = #tpu.dot_dimension_numbers<[1], [0], [0], [1], [0, 0, 1, 1], [], []>} : vector<8x128xbf16>, vector<128x128xbf16>, vector<8x128xf32> -> vector<8x128xf32>
      %22 = vector.broadcast %18 : vector<8x1xf32> to vector<8x128xf32>
      %23 = arith.mulf %21, %22 : vector<8x128xf32>
      %c0_17 = arith.constant 0 : index
      %c0_18 = arith.constant 0 : index
      %24 = vector.load %arg5[%c0_17, %c0_18] : memref<8x128xf32, #tpu.memory_space<vmem>>, vector<8x128xf32>
      tpu.vector_store %arg5[%c0_17, %c0_18], %23 {strides = array<i32>} : memref<8x128xf32, #tpu.memory_space<vmem>>, vector<8x128xf32>,
    } else {
    }
    return
  }
  func.func @transform_0(%arg0: i32, %arg1: i32) -> (i32, i32) {
    %c0_i32 = arith.constant 0 : i32
    return %arg0, %arg1 : i32, i32
  }
  func.func @transform_1(%arg0: i32, %arg1: i32) -> (i32, i32) {
    %c0_i32 = arith.constant 0 : i32
    %c0_i32_0 = arith.constant 0 : i32
    return %arg1, %c0_i32 : i32, i32
  }
  func.func @transform_2(%arg0: i32, %arg1: i32) -> (i32, i32) {
    %c0_i32 = arith.constant 0 : i32
    %c0_i32_0 = arith.constant 0 : i32
    %c0_i32_1 = arith.constant 0 : i32
    return %c0_i32, %c0_i32_0 : i32, i32
  }
  func.func @transform_3(%arg0: i32, %arg1: i32) -> (i32, i32) {
    %c0_i32 = arith.constant 0 : i32
    %c0_i32_0 = arith.constant 0 : i32
    return %arg0, %c0_i32 : i32, i32
  }
}

</mosaic_0001>

<bundles_post_ra>
// kernel: tpu_custom_call.1
= control target key start
LH: loop header
LB: loop body
LE: loop exit
PB: predicated region body
PF: predicated region fallthrough
CT: control target
= control target key end

     0   :  { %8 = vsyncpa [#allocation4], 0  ;;  %s1312_s0 = inlined_call_operand.hbm [shape: bf16[8,1024], index: 0, kind: input, shape index: {}]   ;;  %s1313_s1 = inlined_call_operand.hbm [shape: bf16[1024,128], index: 1, kind: input, shape index: {}]   ;;  %s1314_s2 = inlined_call_operand.hbm [shape: bf16[128,128], index: 2, kind: input, shape index: {}]   ;;  %s1315_s3 = inlined_call_operand.hbm [shape: f32[8,128], index: 3, kind: output, shape index: {}]  }
   0x1   :  { %9 = vsyncpa [#allocation7], 0 }
   0x2   :  { %10 = vsyncpa [#allocation5], 0  ;;  %s1272_s12 = smov [#allocation6]  }
   0x3   :  { %s26_s13 = sshll.u32 %s1272_s12, 4  ;;  %s27_s13 = int_to_ptr.vmem [resolvable:$true] %s26_s13 }
   0x4   :  { %s1194_s14 = scalar_lea.vmem %s27_s13, 8192  ;;  %p1199_p1 = scmp.lt.s32.totalorder %s27_s13, %s27_s13 }
   0x5   :  { %p1195_p0 = scmp.ne.s32.totalorder %s27_s13, %s1194_s14  ;;  %p1200_p2 = scmp.lt.s32.totalorder %s1194_s14, %s1194_s14 }
   0x7   :  { %p1201_p3 = por %p1200_p2, %p1199_p1 }
   0x9   :  { %p1202_p4 = pnand %p1201_p3, %p1195_p0 }
   0xb   :  { %1205 = shalt.err (!%p1202_p4)
}
   0xc   :  { %s1273_s15 = smov 64   ;;  %s1274_s16 = smov 4  }
   0xd   :  { %32 = dma.hbm_to_vmem [thread:$0]  %s1313_s1, 8192, %s27_s13, [#allocation7], %s1273_s15, %s1273_s15, %s1274_s16  }
   0xe   :  { %s1275_s19 = smov [#allocation3]   ;;  %s1276_s21 = smov [#allocation8]  }
   0xf   :  { %s17_s20 = sshll.u32 %s1275_s19, 4  ;;  %s38_s22 = sshll.u32 %s1276_s21, 4  ;;  %s18_s20 = int_to_ptr.vmem [resolvable:$true] %s17_s20  ;;  %s39_s22 = int_to_ptr.vmem [resolvable:$true] %s38_s22 }
  0x10   :  { %s1214_s23 = scalar_lea.vmem %s18_s20, 512  ;;  %p1219_p6 = scmp.lt.s32.totalorder %s18_s20, %s18_s20 }
  0x11   :  { %p1215_p5 = scmp.ne.s32.totalorder %s18_s20, %s1214_s23  ;;  %p1220_p7 = scmp.lt.s32.totalorder %s1214_s23, %s1214_s23 }
  0x13   :  { %p1221_p8 = por %p1220_p7, %p1219_p6 }
  0x15   :  { %p1222_p9 = pnand %p1221_p8, %p1215_p5 }
  0x17   :  { %1225 = shalt.err (!%p1222_p9)
}
  0x18   :  { %20 = dma.hbm_to_vmem [thread:$0]  %s1312_s0, 512, %s18_s20, [#allocation4]  }
  0x19   :  { %s1234_s26 = scalar_lea.vmem %s39_s22, 1024  ;;  %p1239_p11 = scmp.lt.s32.totalorder %s39_s22, %s39_s22 }
  0x1a   :  { %p1235_p10 = scmp.ne.s32.totalorder %s39_s22, %s1234_s26  ;;  %p1240_p12 = scmp.lt.s32.totalorder %s1234_s26, %s1234_s26 }
  0x1c   :  { %p1241_p13 = por %p1240_p12, %p1239_p11 }
  0x1e   :  { %p1242_p0 = pnand %p1241_p13, %p1235_p10 }
  0x20   :  { %1245 = shalt.err (!%p1242_p0)
}
  0x21   :  { %44 = dma.hbm_to_vmem [thread:$0]  %s1314_s2, 1024, %s39_s22, [#allocation7], %s1273_s15, %s1273_s15, %s1274_s16  }
  0x22   :  { %1266 = dma.done.wait [#allocation4], 512  }
  0x23   :  { %1267 = vsyncadd [#allocation4], 4294966784 }
  0x24   :  { %1268 = dma.done.wait [#allocation7], 9216  }
  0x25   :  { %1269 = vsyncadd [#allocation7], 4294958080  ;;  %v1104_v0 = vld [vmem:[#allocation6 + $0x78] sm:$0xff]   ;;  %v1108_v4 = vld [vmem:[#allocation6 + $0x70] sm:$0xff]   ;;  %vm1278_vm0 = vmmov 0   ;;  %s1279_s0 = smov [#allocation9]  }
  0x26   :  { %v1105_v1 = vld [vmem:[#allocation6 + $0xf8] sm:$0xff]   ;;  %979 = vmatprep.subr.bf16.mxu0 %v1104_v0  ;;  %v1109_v5 = vld [vmem:[#allocation6 + $0xf0] sm:$0xff]   ;;  %v1112_v8 = vld [vmem:[#allocation6 + $0x68] sm:$0xff]   ;;  %s889_s2 = sshll.u32 %s1279_s0, 4  ;;  %s890_s2 = int_to_ptr.vmem [resolvable:$true] %s889_s2 }
  0x27   :  { %v1106_v2 = vld [vmem:[#allocation6 + $0x38] sm:$0xff]   ;;  %1001 = vmatprep.subr.bf16.mxu1 %v1105_v1  ;;  %v1110_v6 = vld [vmem:[#allocation6 + $0x30] sm:$0xff]   ;;  %v1113_v9 = vld [vmem:[#allocation6 + $0xe8] sm:$0xff]   ;;  %s1246_s28 = scalar_lea.vmem %s890_s2, 128  ;;  %p1251_p2 = scmp.lt.s32.totalorder %s890_s2, %s890_s2 }
  0x28   :  { %v1107_v3 = vld [vmem:[#allocation6 + $0xb8] sm:$0xff]   ;;  %980 = vmatpush3.bf16.msra.mxu0 %v1106_v2  ;;  %v1111_v7 = vld [vmem:[#allocation6 + $0xb0] sm:$0xff]   ;;  %v1114_v10 = vld [vmem:[#allocation6 + $0x28] sm:$0xff]   ;;  %p1247_p1 = scmp.ne.s32.totalorder %s890_s2, %s1246_s28  ;;  %p1252_p3 = scmp.lt.s32.totalorder %s1246_s28, %s1246_s28 }
  0x29   :  { %1002 = vmatpush3.bf16.msra.mxu1 %v1107_v3  ;;  %981 = vmatprep.subr.bf16.mxu0 %v1108_v4  ;;  %v1115_v11 = vld [vmem:[#allocation6 + $0xa8] sm:$0xff]   ;;  %v1116_v12 = vld [vmem:[#allocation6 + $0x60] sm:$0xff]   ;;  %v1120_v16 = vld [vmem:[#allocation6 + $0x58] sm:$0xff]  }
  0x2a   :  { %1003 = vmatprep.subr.bf16.mxu1 %v1109_v5  ;;  %v1117_v13 = vld [vmem:[#allocation6 + $0xe0] sm:$0xff]   ;;  %v1121_v17 = vld [vmem:[#allocation6 + $0xd8] sm:$0xff]   ;;  %v1124_v20 = vld [vmem:[#allocation6 + $0x50] sm:$0xff]   ;;  %p1253_p4 = por %p1252_p3, %p1251_p2 }
  0x2b   :  { %v1118_v14 = vld [vmem:[#allocation6 + $0x20] sm:$0xff]   ;;  %v1122_v18 = vld [vmem:[#allocation6 + $0x18] sm:$0xff]   ;;  %v1125_v21 = vld [vmem:[#allocation6 + $0xd0] sm:$0xff]  }
  0x2c   :  { %982 = vmatpush3.bf16.msra.mxu0 %v1110_v6  ;;  %v1119_v15 = vld [vmem:[#allocation6 + $0xa0] sm:$0xff]   ;;  %v1123_v19 = vld [vmem:[#allocation6 + $0x98] sm:$0xff]   ;;  %v1126_v22 = vld [vmem:[#allocation6 + $0x10] sm:$0xff]   ;;  %p1254_p5 = pnand %p1253_p4, %p1247_p1 }
  0x2d   :  { %1004 = vmatpush3.bf16.msra.mxu1 %v1111_v7  ;;  %983 = vmatprep.subr.bf16.mxu0 %v1112_v8  ;;  %v1127_v23 = vld [vmem:[#allocation6 + $0x90] sm:$0xff]   ;;  %v1128_v24 = vld [vmem:[#allocation6 + $0x48] sm:$0xff]   ;;  %v1132_v28 = vld [vmem:[#allocation6 + $0x40] sm:$0xff]  }
  0x2e   :  { %1005 = vmatprep.subr.bf16.mxu1 %v1113_v9  ;;  %v1129_v25 = vld [vmem:[#allocation6 + $0xc8] sm:$0xff]   ;;  %v1133_v29 = vld [vmem:[#allocation6 + $0xc0] sm:$0xff]   ;;  %v1140_v38 = vld [vmem:[#allocation6 + $0x178] sm:$0xff]  }
  0x2f   :  { %v1130_v26 = vld [vmem:[#allocation6 + $0x8] sm:$0xff]   ;;  %v1134_v30 = vld [vmem:[#allocation6] sm:$0xff]   ;;  %v1141_v39 = vld [vmem:[#allocation6 + $0x1f8] sm:$0xff]  }
  0x30   :  { %984 = vmatpush3.bf16.msra.mxu0 %v1114_v10  ;;  %v1131_v27 = vld [vmem:[#allocation6 + $0x88] sm:$0xff]   ;;  %v1135_v31 = vld [vmem:[#allocation6 + $0x80] sm:$0xff]   ;;  %v1142_v40 = vld [vmem:[#allocation6 + $0x138] sm:$0xff]  }
  0x31   :  { %1006 = vmatpush3.bf16.msra.mxu1 %v1115_v11  ;;  %985 = vmatprep.subr.bf16.mxu0 %v1116_v12  ;;  %v61_v32 = vld [vmem:[#allocation3] sm:$0xff]  ;;  %v62_v33 = vld [vmem:[#allocation3 + $0x8] sm:$0xff]  ;;  %v1143_v41 = vld [vmem:[#allocation6 + $0x1b8] sm:$0xff]  }
  0x32   :  { %1007 = vmatprep.subr.bf16.mxu1 %v1117_v13  ;;  %v899_v34 = vcombine.low %v61_v32, %v61_v32  ;;  %v900_v35 = vcombine.high %v61_v32, %v61_v32  ;;  %v901_v36 = vcombine.low %v62_v33, %v62_v33  ;;  %v902_v37 = vcombine.high %v62_v33, %v62_v33  ;;  %v1144_v42 = vld [vmem:[#allocation6 + $0x170] sm:$0xff]   ;;  %v1148_v46 = vld [vmem:[#allocation6 + $0x168] sm:$0xff]   ;;  %v1152_v50 = vld [vmem:[#allocation6 + $0x160] sm:$0xff]  }
  0x33   :  { %v1145_v43 = vld [vmem:[#allocation6 + $0x1f0] sm:$0xff]   ;;  %v1149_v47 = vld [vmem:[#allocation6 + $0x1e8] sm:$0xff]   ;;  %v1153_v51 = vld [vmem:[#allocation6 + $0x1e0] sm:$0xff]   ;;  %v1277_v13 = vmov 0.0  }
  0x34   :  { %986 = vmatpush3.bf16.msra.mxu0 %v1118_v14  ;;  %637 = vmatprep.mubr.bf16.mxu0 %v900_v35  ;;  %v1146_v44 = vld [vmem:[#allocation6 + $0x130] sm:$0xff]   ;;  %v1150_v48 = vld [vmem:[#allocation6 + $0x128] sm:$0xff]   ;;  %v1154_v52 = vld [vmem:[#allocation6 + $0x120] sm:$0xff]  }
  0x35   :  { %1008 = vmatpush3.bf16.msra.mxu1 %v1119_v15  ;;  %987 = vmatprep.subr.bf16.mxu0 %v1120_v16  ;;  %v1147_v45 = vld [vmem:[#allocation6 + $0x1b0] sm:$0xff]   ;;  %v1151_v49 = vld [vmem:[#allocation6 + $0x1a8] sm:$0xff]   ;;  %v1155_v53 = vld [vmem:[#allocation6 + $0x1a0] sm:$0xff]  }
  0x36   :  { %1009 = vmatprep.subr.bf16.mxu1 %v1121_v17  ;;  %677 = vmatprep.mubr.bf16.mxu1 %v902_v37  ;;  %v1156_v54 = vld [vmem:[#allocation6 + $0x158] sm:$0xff]   ;;  %v1160_v58 = vld [vmem:[#allocation6 + $0x150] sm:$0xff]   ;;  %v1164_v62 = vld [vmem:[#allocation6 + $0x148] sm:$0xff]  }
  0x37   :  { %v1157_v55 = vld [vmem:[#allocation6 + $0x1d8] sm:$0xff]   ;;  %v1161_v59 = vld [vmem:[#allocation6 + $0x1d0] sm:$0xff]   ;;  %v1165_v63 = vld [vmem:[#allocation6 + $0x1c8] sm:$0xff]  }
  0x38   :  { %988 = vmatpush3.bf16.msra.mxu0 %v1122_v18  ;;  %v1158_v56 = vld [vmem:[#allocation6 + $0x118] sm:$0xff]   ;;  %v1162_v60 = vld [vmem:[#allocation6 + $0x110] sm:$0xff]   ;;  %v1166_v0 = vld [vmem:[#allocation6 + $0x108] sm:$0xff]  }
  0x39   :  { %1010 = vmatpush3.bf16.msra.mxu1 %v1123_v19  ;;  %989 = vmatprep.subr.bf16.mxu0 %v1124_v20  ;;  %v1159_v57 = vld [vmem:[#allocation6 + $0x198] sm:$0xff]   ;;  %v1163_v61 = vld [vmem:[#allocation6 + $0x190] sm:$0xff]   ;;  %v1167_v1 = vld [vmem:[#allocation6 + $0x188] sm:$0xff]  }
  0x3a   :  { %1011 = vmatprep.subr.bf16.mxu1 %v1125_v21  ;;  %v1168_v2 = vld [vmem:[#allocation6 + $0x140] sm:$0xff]   ;;  %v63_v6 = vld [vmem:[#allocation3 + $0x10] sm:$0xff]  ;;  %v64_v9 = vld [vmem:[#allocation3 + $0x18] sm:$0xff] }
  0x3b   :  { %v1169_v3 = vld [vmem:[#allocation6 + $0x1c0] sm:$0xff]   ;;  %v903_v7 = vcombine.low %v63_v6, %v63_v6  ;;  %v904_v8 = vcombine.high %v63_v6, %v63_v6  ;;  %v905_v10 = vcombine.low %v64_v9, %v64_v9  ;;  %v906_v11 = vcombine.high %v64_v9, %v64_v9  ;;  %v1176_v12 = vld [vmem:[#allocation8 + $0x38] sm:$0xff]   ;;  %v1177_v14 = vld [vmem:[#allocation8 + $0x30] sm:$0xff]  }
  0x3c   :  { %990 = vmatpush3.bf16.msra.mxu0 %v1126_v22  ;;  %v1170_v4 = vld [vmem:[#allocation6 + $0x100] sm:$0xff]   ;;  %v1178_v15 = vld [vmem:[#allocation8 + $0x28] sm:$0xff]   ;;  %v1180_v17 = vld [vmem:[#allocation8 + $0x18] sm:$0xff]  }
  0x3d   :  { %1012 = vmatpush3.bf16.msra.mxu1 %v1127_v23  ;;  %991 = vmatprep.subr.bf16.mxu0 %v1128_v24  ;;  %v1171_v5 = vld [vmem:[#allocation6 + $0x180] sm:$0xff]   ;;  %v1181_v18 = vld [vmem:[#allocation8 + $0x10] sm:$0xff]   ;;  %v1182_v19 = vld [vmem:[#allocation8 + $0x8] sm:$0xff]  }
  0x3e   :  { %1013 = vmatprep.subr.bf16.mxu1 %v1129_v25  ;;  %v1179_v16 = vld [vmem:[#allocation8 + $0x20] sm:$0xff]  }
  0x3f   :  { %v1183_v20 = vld [vmem:[#allocation8] sm:$0xff]  }
  0x40   :  { %992 = vmatpush3.bf16.msra.mxu0 %v1130_v26 }
  0x41   :  { %1014 = vmatpush3.bf16.msra.mxu1 %v1131_v27  ;;  %993 = vmatprep.subr.bf16.mxu0 %v1132_v28 }
  0x42   :  { %1015 = vmatprep.subr.bf16.mxu1 %v1133_v29 }
  0x44   :  { %994 = vmatpush3.bf16.msra.mxu0 %v1134_v30 }
  0x45   :  { %1016 = vmatpush3.bf16.msra.mxu1 %v1135_v31  ;;  %1023 = vmatprep.subr.bf16.mxu0 %v1140_v38 }
  0x46   :  { %1045 = vmatprep.subr.bf16.mxu1 %v1141_v39 }
  0x47   :  { %638 = vmatmul.mubr.bf16.vlgmr.msra.gmra.mxu0 %v899_v34 }
  0x48   :  { %678 = vmatmul.mubr.bf16.vlgmr.msra.gmra.mxu1 %v901_v36  ;;  %1024 = vmatpush3.bf16.msra.mxu0 %v1142_v40 }
  0x49   :  { %1046 = vmatpush3.bf16.msra.mxu1 %v1143_v41  ;;  %1025 = vmatprep.subr.bf16.mxu0 %v1144_v42 }
  0x4a   :  { %1047 = vmatprep.subr.bf16.mxu1 %v1145_v43  ;;  %717 = vmatprep.mubr.bf16.mxu0 %v904_v8 }
  0x4b   :  { %757 = vmatprep.mubr.bf16.mxu1 %v906_v11 }
  0x4c   :  { %1026 = vmatpush3.bf16.msra.mxu0 %v1146_v44 }
  0x4d   :  { %1048 = vmatpush3.bf16.msra.mxu1 %v1147_v45  ;;  %1027 = vmatprep.subr.bf16.mxu0 %v1148_v46 }
  0x4e   :  { %1049 = vmatprep.subr.bf16.mxu1 %v1149_v47 }
  0x50   :  { %1028 = vmatpush3.bf16.msra.mxu0 %v1150_v48 }
  0x51   :  { %1050 = vmatpush3.bf16.msra.mxu1 %v1151_v49  ;;  %1029 = vmatprep.subr.bf16.mxu0 %v1152_v50 }
  0x52   :  { %1051 = vmatprep.subr.bf16.mxu1 %v1153_v51 }
  0x54   :  { %1030 = vmatpush3.bf16.msra.mxu0 %v1154_v52 }
  0x55   :  { %1052 = vmatpush3.bf16.msra.mxu1 %v1155_v53  ;;  %1031 = vmatprep.subr.bf16.mxu0 %v1156_v54 }
  0x56   :  { %1053 = vmatprep.subr.bf16.mxu1 %v1157_v55 }
  0x58   :  { %1032 = vmatpush3.bf16.msra.mxu0 %v1158_v56 }
  0x59   :  { %1054 = vmatpush3.bf16.msra.mxu1 %v1159_v57  ;;  %1033 = vmatprep.subr.bf16.mxu0 %v1160_v58 }
  0x5a   :  { %1055 = vmatprep.subr.bf16.mxu1 %v1161_v59 }
  0x5c   :  { %1034 = vmatpush3.bf16.msra.mxu0 %v1162_v60 }
  0x5d   :  { %1056 = vmatpush3.bf16.msra.mxu1 %v1163_v61  ;;  %1035 = vmatprep.subr.bf16.mxu0 %v1164_v62 }
  0x5e   :  { %1057 = vmatprep.subr.bf16.mxu1 %v1165_v63 }
  0x60   :  { %1036 = vmatpush3.bf16.msra.mxu0 %v1166_v0 }
  0x61   :  { %1058 = vmatpush3.bf16.msra.mxu1 %v1167_v1  ;;  %1037 = vmatprep.subr.bf16.mxu0 %v1168_v2 }
  0x62   :  { %1059 = vmatprep.subr.bf16.mxu1 %v1169_v3 }
  0x64   :  { %1038 = vmatpush3.bf16.msra.mxu0 %v1170_v4 }
  0x65   :  { %1060 = vmatpush3.bf16.msra.mxu1 %v1171_v5  ;;  %1076 = vmatprep.subr.bf16.mxu0 %v1277_v13 }
  0x67   :  { %718 = vmatmul.mubr.bf16.vlgmr.msra.gmra.mxu0 %v903_v7 }
  0x68   :  { %758 = vmatmul.mubr.bf16.vlgmr.msra.gmra.mxu1 %v905_v10  ;;  %1077 = vmatpush3.bf16.msra.mxu0 %v1176_v12 }
  0x69   :  { %1078 = vmatprep.subr.bf16.mxu0 %v1277_v13  ;;  %1092 = vmatprep.mubr.msk.bf16.mxu0 %vm1278_vm0, %v1277_v13 }
  0x6c   :  { %1079 = vmatpush3.bf16.msra.mxu0 %v1177_v14 }
  0x6d   :  { %1080 = vmatprep.subr.bf16.mxu0 %v1277_v13 }
  0x70   :  { %1081 = vmatpush3.bf16.msra.mxu0 %v1178_v15 }
  0x71   :  { %1082 = vmatprep.subr.bf16.mxu0 %v1277_v13 }
  0x74   :  { %1083 = vmatpush3.bf16.msra.mxu0 %v1179_v16 }
  0x75   :  { %1084 = vmatprep.subr.bf16.mxu0 %v1277_v13 }
  0x78   :  { %1085 = vmatpush3.bf16.msra.mxu0 %v1180_v17 }
  0x79   :  { %1086 = vmatprep.subr.bf16.mxu0 %v1277_v13 }
  0x7c   :  { %1087 = vmatpush3.bf16.msra.mxu0 %v1181_v18 }
  0x7d   :  { %1088 = vmatprep.subr.bf16.mxu0 %v1277_v13 }
  0x80   :  { %1089 = vmatpush3.bf16.msra.mxu0 %v1182_v19 }
  0x81   :  { %1090 = vmatprep.subr.bf16.mxu0 %v1277_v13 }
  0x84   :  { %1091 = vmatpush3.bf16.msra.mxu0 %v1183_v20 }
 0x107   :  { %v995_v21 = vpop.f32.mrf.mxu0 }
 0x108   :  { %v1017_v22 = vpop.f32.mrf.mxu1 }
 0x109   :  { %v996_v23 = vpop.f32.mrf.mxu0 }
 0x10a   :  { %v1018_v24 = vpop.f32.mrf.mxu1  ;;  %v997_v29 = vadd.f32 %v996_v23, %v995_v21 }
 0x10b   :  { %v998_v25 = vpop.f32.mrf.mxu0  ;;  %v1019_v30 = vadd.f32 %v1018_v24, %v1017_v22 }
 0x10c   :  { %v1020_v26 = vpop.f32.mrf.mxu1 }
 0x10d   :  { %v999_v27 = vpop.f32.mrf.mxu0  ;;  %v680_v35 = vadd.f32 %v1019_v30, %v997_v29 }
 0x10e   :  { %v1021_v28 = vpop.f32.mrf.mxu1 }
 0x127   :  { %v1039_v31 = vpop.f32.mrf.mxu0 }
 0x128   :  { %v1061_v32 = vpop.f32.mrf.mxu1 }
 0x129   :  { %v1040_v33 = vpop.f32.mrf.mxu0 }
 0x12a   :  { %v1062_v34 = vpop.f32.mrf.mxu1  ;;  %v1041_v36 = vadd.f32 %v1040_v33, %v1039_v31 }
 0x12b   :  { %v1042_v37 = vpop.f32.mrf.mxu0  ;;  %v1063_v40 = vadd.f32 %v1062_v34, %v1061_v32 }
 0x12c   :  { %v1064_v38 = vpop.f32.mrf.mxu1  ;;  %v720_v39 = vadd.f32 %v1041_v36, %v680_v35 }
 0x12d   :  { %v1043_v41 = vpop.f32.mrf.mxu0 }
 0x12e   :  { %v1065_v42 = vpop.f32.mrf.mxu1  ;;  %v760_v43 = vadd.f32 %v1063_v40, %v720_v39 }
 0x130   :  { %v771_v44 = vmul.f32 %v760_v43, %v760_v43  ;;  %v776_v45 = vpack.c.bf16 %v760_v43, %v760_v43 }
 0x132   :  { %772 = vadd.xlane.f32.xlu0 %v771_v44  ;;  %1093 = vmatmul.mubr.bf16.vlgmr.msra.gmra.mxu0 %v776_v45 }
 0x1bb   :  { %v773_v46 = vpop.xlane.xlu0 %772 }
 0x1bc   :  { %v774_v47 = vmax.f32 %v773_v46, 1e-30 }
 0x1be   :  { %1184 = vrsqrt.f32 %v774_v47 }
 0x1cb   :  { %v1185_v48 = vpop.eup %1184 }
 0x1f2   :  { %v875_v49 = vpop.f32.mrf.mxu0 }
 0x1f3   :  { %v881_v50 = vmul.f32 %v1185_v48, %v875_v49 }
 0x1f4   :  { %v1094_v51 = vpop.f32.mrf.mxu0 }
 0x1f5   :  { %882 = vst [vmem:[#allocation9] sm:$0xff] %v881_v50 }
 0x1f6   :  { %v878_v52 = vpop.f32.mrf.mxu0 }
 0x1f7   :  { %1257 = shalt.err (!%p1254_p5)
}
 0x1f8   :  { %892 = dma.vmem_to_hbm [thread:$0]  %s890_s2, 128, %s1315_s3, [#allocation5]   ;;  %v1095_v53 = vpop.f32.mrf.mxu0 }
 0x1f9   :  { %1270 = dma.done.wait [#allocation5], 128  }
 0x1fa   :  { %1271 = vsyncadd [#allocation5], 4294967168 }
 0x1fb   :  { %896 = vsyncpa [#allocation4], 1 }
 0x1fc   :  { %897 = vsyncpa [#allocation7], 1 }
 0x1fd   :  { %898 = vsyncpa [#allocation5], 1 }

// kernel: tpu_custom_call.1
= control target key start
LH: loop header
LB: loop body
LE: loop exit
PB: predicated region body
PF: predicated region fallthrough
CT: control target
= control target key end

     0   :  { %8 = vsyncpa [#allocation4], 0  ;;  %s1312_s0 = inlined_call_operand.hbm [shape: bf16[8,1024], index: 0, kind: input, shape index: {}]   ;;  %s1313_s1 = inlined_call_operand.hbm [shape: bf16[1024,128], index: 1, kind: input, shape index: {}]   ;;  %s1314_s2 = inlined_call_operand.hbm [shape: bf16[128,128], index: 2, kind: input, shape index: {}]   ;;  %s1315_s3 = inlined_call_operand.hbm [shape: f32[8,128], index: 3, kind: output, shape index: {}]  }
   0x1   :  { %9 = vsyncpa [#allocation7], 0 }
   0x2   :  { %10 = vsyncpa [#allocation5], 0  ;;  %s1272_s12 = smov [#allocation6]  }
   0x3   :  { %s26_s13 = sshll.u32 %s1272_s12, 4  ;;  %s27_s13 = int_to_ptr.vmem [resolvable:$true] %s26_s13 }
   0x4   :  { %s1194_s14 = scalar_lea.vmem %s27_s13, 8192  ;;  %p1199_p1 = scmp.lt.s32.totalorder %s27_s13, %s27_s13 }
   0x5   :  { %p1195_p0 = scmp.ne.s32.totalorder %s27_s13, %s1194_s14  ;;  %p1200_p2 = scmp.lt.s32.totalorder %s1194_s14, %s1194_s14 }
   0x7   :  { %p1201_p3 = por %p1200_p2, %p1199_p1 }
   0x9   :  { %p1202_p4 = pnand %p1201_p3, %p1195_p0 }
   0xb   :  { %1205 = shalt.err (!%p1202_p4)
}
   0xc   :  { %s1273_s15 = smov 64   ;;  %s1274_s16 = smov 4  }
   0xd   :  { %32 = dma.hbm_to_vmem [thread:$0]  %s1313_s1, 8192, %s27_s13, [#allocation7], %s1273_s15, %s1273_s15, %s1274_s16  }
   0xe   :  { %s1275_s19 = smov [#allocation3]   ;;  %s1276_s21 = smov [#allocation8]  }
   0xf   :  { %s17_s20 = sshll.u32 %s1275_s19, 4  ;;  %s38_s22 = sshll.u32 %s1276_s21, 4  ;;  %s18_s20 = int_to_ptr.vmem [resolvable:$true] %s17_s20  ;;  %s39_s22 = int_to_ptr.vmem [resolvable:$true] %s38_s22 }
  0x10   :  { %s1214_s23 = scalar_lea.vmem %s18_s20, 512  ;;  %p1219_p6 = scmp.lt.s32.totalorder %s18_s20, %s18_s20 }
  0x11   :  { %p1215_p5 = scmp.ne.s32.totalorder %s18_s20, %s1214_s23  ;;  %p1220_p7 = scmp.lt.s32.totalorder %s1214_s23, %s1214_s23 }
  0x13   :  { %p1221_p8 = por %p1220_p7, %p1219_p6 }
  0x15   :  { %p1222_p9 = pnand %p1221_p8, %p1215_p5 }
  0x17   :  { %1225 = shalt.err (!%p1222_p9)
}
  0x18   :  { %20 = dma.hbm_to_vmem [thread:$0]  %s1312_s0, 512, %s18_s20, [#allocation4]  }
  0x19   :  { %s1234_s26 = scalar_lea.vmem %s39_s22, 1024  ;;  %p1239_p11 = scmp.lt.s32.totalorder %s39_s22, %s39_s22 }
  0x1a   :  { %p1235_p10 = scmp.ne.s32.totalorder %s39_s22, %s1234_s26  ;;  %p1240_p12 = scmp.lt.s32.totalorder %s1234_s26, %s1234_s26 }
  0x1c   :  { %p1241_p13 = por %p1240_p12, %p1239_p11 }
  0x1e   :  { %p1242_p0 = pnand %p1241_p13, %p1235_p10 }
  0x20   :  { %1245 = shalt.err (!%p1242_p0)
}
  0x21   :  { %44 = dma.hbm_to_vmem [thread:$0]  %s1314_s2, 1024, %s39_s22, [#allocation7], %s1273_s15, %s1273_s15, %s1274_s16  }
  0x22   :  { %1266 = dma.done.wait [#allocation4], 512  }
  0x23   :  { %1267 = vsyncadd [#allocation4], 4294966784 }
  0x24   :  { %1268 = dma.done.wait [#allocation7], 9216  }
  0x25   :  { %1269 = vsyncadd [#allocation7], 4294958080  ;;  %v1104_v0 = vld [vmem:[#allocation6 + $0x78] sm:$0xff]   ;;  %v1108_v4 = vld [vmem:[#allocation6 + $0x70] sm:$0xff]   ;;  %vm1278_vm0 = vmmov 0   ;;  %s1279_s0 = smov [#allocation9]  }
  0x26   :  { %v1105_v1 = vld [vmem:[#allocation6 + $0xf8] sm:$0xff]   ;;  %979 = vmatprep.subr.bf16.mxu0 %v1104_v0  ;;  %v1109_v5 = vld [vmem:[#allocation6 + $0xf0] sm:$0xff]   ;;  %v1112_v8 = vld [vmem:[#allocation6 + $0x68] sm:$0xff]   ;;  %s889_s2 = sshll.u32 %s1279_s0, 4  ;;  %s890_s2 = int_to_ptr.vmem [resolvable:$true] %s889_s2 }
  0x27   :  { %v1106_v2 = vld [vmem:[#allocation6 + $0x38] sm:$0xff]   ;;  %1001 = vmatprep.subr.bf16.mxu1 %v1105_v1  ;;  %v1110_v6 = vld [vmem:[#allocation6 + $0x30] sm:$0xff]   ;;  %v1113_v9 = vld [vmem:[#allocation6 + $0xe8] sm:$0xff]   ;;  %s1246_s28 = scalar_lea.vmem %s890_s2, 128  ;;  %p1251_p2 = scmp.lt.s32.totalorder %s890_s2, %s890_s2 }
  0x28   :  { %v1107_v3 = vld [vmem:[#allocation6 + $0xb8] sm:$0xff]   ;;  %980 = vmatpush3.bf16.msra.mxu0 %v1106_v2  ;;  %v1111_v7 = vld [vmem:[#allocation6 + $0xb0] sm:$0xff]   ;;  %v1114_v10 = vld [vmem:[#allocation6 + $0x28] sm:$0xff]   ;;  %p1247_p1 = scmp.ne.s32.totalorder %s890_s2, %s1246_s28  ;;  %p1252_p3 = scmp.lt.s32.totalorder %s1246_s28, %s1246_s28 }
  0x29   :  { %1002 = vmatpush3.bf16.msra.mxu1 %v1107_v3  ;;  %981 = vmatprep.subr.bf16.mxu0 %v1108_v4  ;;  %v1115_v11 = vld [vmem:[#allocation6 + $0xa8] sm:$0xff]   ;;  %v1116_v12 = vld [vmem:[#allocation6 + $0x60] sm:$0xff]   ;;  %v1120_v16 = vld [vmem:[#allocation6 + $0x58] sm:$0xff]  }
  0x2a   :  { %1003 = vmatprep.subr.bf16.mxu1 %v1109_v5  ;;  %v1117_v13 = vld [vmem:[#allocation6 + $0xe0] sm:$0xff]   ;;  %v1121_v17 = vld [vmem:[#allocation6 + $0xd8] sm:$0xff]   ;;  %v1124_v20 = vld [vmem:[#allocation6 + $0x50] sm:$0xff]   ;;  %p1253_p4 = por %p1252_p3, %p1251_p2 }
  0x2b   :  { %v1118_v14 = vld [vmem:[#allocation6 + $0x20] sm:$0xff]   ;;  %v1122_v18 = vld [vmem:[#allocation6 + $0x18] sm:$0xff]   ;;  %v1125_v21 = vld [vmem:[#allocation6 + $0xd0] sm:$0xff]  }
  0x2c   :  { %982 = vmatpush3.bf16.msra.mxu0 %v1110_v6  ;;  %v1119_v15 = vld [vmem:[#allocation6 + $0xa0] sm:$0xff]   ;;  %v1123_v19 = vld [vmem:[#allocation6 + $0x98] sm:$0xff]   ;;  %v1126_v22 = vld [vmem:[#allocation6 + $0x10] sm:$0xff]   ;;  %p1254_p5 = pnand %p1253_p4, %p1247_p1 }
  0x2d   :  { %1004 = vmatpush3.bf16.msra.mxu1 %v1111_v7  ;;  %983 = vmatprep.subr.bf16.mxu0 %v1112_v8  ;;  %v1127_v23 = vld [vmem:[#allocation6 + $0x90] sm:$0xff]   ;;  %v1128_v24 = vld [vmem:[#allocation6 + $0x48] sm:$0xff]   ;;  %v1132_v28 = vld [vmem:[#allocation6 + $0x40] sm:$0xff]  }
  0x2e   :  { %1005 = vmatprep.subr.bf16.mxu1 %v1113_v9  ;;  %v1129_v25 = vld [vmem:[#allocation6 + $0xc8] sm:$0xff]   ;;  %v1133_v29 = vld [vmem:[#allocation6 + $0xc0] sm:$0xff]   ;;  %v1140_v38 = vld [vmem:[#allocation6 + $0x178] sm:$0xff]  }
  0x2f   :  { %v1130_v26 = vld [vmem:[#allocation6 + $0x8] sm:$0xff]   ;;  %v1134_v30 = vld [vmem:[#allocation6] sm:$0xff]   ;;  %v1141_v39 = vld [vmem:[#allocation6 + $0x1f8] sm:$0xff]  }
  0x30   :  { %984 = vmatpush3.bf16.msra.mxu0 %v1114_v10  ;;  %v1131_v27 = vld [vmem:[#allocation6 + $0x88] sm:$0xff]   ;;  %v1135_v31 = vld [vmem:[#allocation6 + $0x80] sm:$0xff]   ;;  %v1142_v40 = vld [vmem:[#allocation6 + $0x138] sm:$0xff]  }
  0x31   :  { %1006 = vmatpush3.bf16.msra.mxu1 %v1115_v11  ;;  %985 = vmatprep.subr.bf16.mxu0 %v1116_v12  ;;  %v61_v32 = vld [vmem:[#allocation3] sm:$0xff]  ;;  %v62_v33 = vld [vmem:[#allocation3 + $0x8] sm:$0xff]  ;;  %v1143_v41 = vld [vmem:[#allocation6 + $0x1b8] sm:$0xff]  }
  0x32   :  { %1007 = vmatprep.subr.bf16.mxu1 %v1117_v13  ;;  %v899_v34 = vcombine.low %v61_v32, %v61_v32  ;;  %v900_v35 = vcombine.high %v61_v32, %v61_v32  ;;  %v901_v36 = vcombine.low %v62_v33, %v62_v33  ;;  %v902_v37 = vcombine.high %v62_v33, %v62_v33  ;;  %v1144_v42 = vld [vmem:[#allocation6 + $0x170] sm:$0xff]   ;;  %v1148_v46 = vld [vmem:[#allocation6 + $0x168] sm:$0xff]   ;;  %v1152_v50 = vld [vmem:[#allocation6 + $0x160] sm:$0xff]  }
  0x33   :  { %v1145_v43 = vld [vmem:[#allocation6 + $0x1f0] sm:$0xff]   ;;  %v1149_v47 = vld [vmem:[#allocation6 + $0x1e8] sm:$0xff]   ;;  %v1153_v51 = vld [vmem:[#allocation6 + $0x1e0] sm:$0xff]   ;;  %v1277_v13 = vmov 0.0  }
  0x34   :  { %986 = vmatpush3.bf16.msra.mxu0 %v1118_v14  ;;  %637 = vmatprep.mubr.bf16.mxu0 %v900_v35  ;;  %v1146_v44 = vld [vmem:[#allocation6 + $0x130] sm:$0xff]   ;;  %v1150_v48 = vld [vmem:[#allocation6 + $0x128] sm:$0xff]   ;;  %v1154_v52 = vld [vmem:[#allocation6 + $0x120] sm:$0xff]  }
  0x35   :  { %1008 = vmatpush3.bf16.msra.mxu1 %v1119_v15  ;;  %987 = vmatprep.subr.bf16.mxu0 %v1120_v16  ;;  %v1147_v45 = vld [vmem:[#allocation6 + $0x1b0] sm:$0xff]   ;;  %v1151_v49 = vld [vmem:[#allocation6 + $0x1a8] sm:$0xff]   ;;  %v1155_v53 = vld [vmem:[#allocation6 + $0x1a0] sm:$0xff]  }
  0x36   :  { %1009 = vmatprep.subr.bf16.mxu1 %v1121_v17  ;;  %677 = vmatprep.mubr.bf16.mxu1 %v902_v37  ;;  %v1156_v54 = vld [vmem:[#allocation6 + $0x158] sm:$0xff]   ;;  %v1160_v58 = vld [vmem:[#allocation6 + $0x150] sm:$0xff]   ;;  %v1164_v62 = vld [vmem:[#allocation6 + $0x148] sm:$0xff]  }
  0x37   :  { %v1157_v55 = vld [vmem:[#allocation6 + $0x1d8] sm:$0xff]   ;;  %v1161_v59 = vld [vmem:[#allocation6 + $0x1d0] sm:$0xff]   ;;  %v1165_v63 = vld [vmem:[#allocation6 + $0x1c8] sm:$0xff]  }
  0x38   :  { %988 = vmatpush3.bf16.msra.mxu0 %v1122_v18  ;;  %v1158_v56 = vld [vmem:[#allocation6 + $0x118] sm:$0xff]   ;;  %v1162_v60 = vld [vmem:[#allocation6 + $0x110] sm:$0xff]   ;;  %v1166_v0 = vld [vmem:[#allocation6 + $0x108] sm:$0xff]  }
  0x39   :  { %1010 = vmatpush3.bf16.msra.mxu1 %v1123_v19  ;;  %989 = vmatprep.subr.bf16.mxu0 %v1124_v20  ;;  %v1159_v57 = vld [vmem:[#allocation6 + $0x198] sm:$0xff]   ;;  %v1163_v61 = vld [vmem:[#allocation6 + $0x190] sm:$0xff]   ;;  %v1167_v1 = vld [vmem:[#allocation6 + $0x188] sm:$0xff]  }
  0x3a   :  { %1011 = vmatprep.subr.bf16.mxu1 %v1125_v21  ;;  %v1168_v2 = vld [vmem:[#allocation6 + $0x140] sm:$0xff]   ;;  %v63_v6 = vld [vmem:[#allocation3 + $0x10] sm:$0xff]  ;;  %v64_v9 = vld [vmem:[#allocation3 + $0x18] sm:$0xff] }
  0x3b   :  { %v1169_v3 = vld [vmem:[#allocation6 + $0x1c0] sm:$0xff]   ;;  %v903_v7 = vcombine.low %v63_v6, %v63_v6  ;;  %v904_v8 = vcombine.high %v63_v6, %v63_v6  ;;  %v905_v10 = vcombine.low %v64_v9, %v64_v9  ;;  %v906_v11 = vcombine.high %v64_v9, %v64_v9  ;;  %v1176_v12 = vld [vmem:[#allocation8 + $0x38] sm:$0xff]   ;;  %v1177_v14 = vld [vmem:[#allocation8 + $0x30] sm:$0xff]  }
  0x3c   :  { %990 = vmatpush3.bf16.msra.mxu0 %v1126_v22  ;;  %v1170_v4 = vld [vmem:[#allocation6 + $0x100] sm:$0xff]   ;;  %v1178_v15 = vld [vmem:[#allocation8 + $0x28] sm:$0xff]   ;;  %v1180_v17 = vld [vmem:[#allocation8 + $0x18] sm:$0xff]  }
  0x3d   :  { %1012 = vmatpush3.bf16.msra.mxu1 %v1127_v23  ;;  %991 = vmatprep.subr.bf16.mxu0 %v1128_v24  ;;  %v1171_v5 = vld [vmem:[#allocation6 + $0x180] sm:$0xff]   ;;  %v1181_v18 = vld [vmem:[#allocation8 + $0x10] sm:$0xff]   ;;  %v1182_v19 = vld [vmem:[#allocation8 + $0x8] sm:$0xff]  }
  0x3e   :  { %1013 = vmatprep.subr.bf16.mxu1 %v1129_v25  ;;  %v1179_v16 = vld [vmem:[#allocation8 + $0x20] sm:$0xff]  }
  0x3f   :  { %v1183_v20 = vld [vmem:[#allocation8] sm:$0xff]  }
  0x40   :  { %992 = vmatpush3.bf16.msra.mxu0 %v1130_v26 }
  0x41   :  { %1014 = vmatpush3.bf16.msra.mxu1 %v1131_v27  ;;  %993 = vmatprep.subr.bf16.mxu0 %v1132_v28 }
  0x42   :  { %1015 = vmatprep.subr.bf16.mxu1 %v1133_v29 }
  0x44   :  { %994 = vmatpush3.bf16.msra.mxu0 %v1134_v30 }
  0x45   :  { %1016 = vmatpush3.bf16.msra.mxu1 %v1135_v31  ;;  %1023 = vmatprep.subr.bf16.mxu0 %v1140_v38 }
  0x46   :  { %1045 = vmatprep.subr.bf16.mxu1 %v1141_v39 }
  0x47   :  { %638 = vmatmul.mubr.bf16.vlgmr.msra.gmra.mxu0 %v899_v34 }
  0x48   :  { %678 = vmatmul.mubr.bf16.vlgmr.msra.gmra.mxu1 %v901_v36  ;;  %1024 = vmatpush3.bf16.msra.mxu0 %v1142_v40 }
  0x49   :  { %1046 = vmatpush3.bf16.msra.mxu1 %v1143_v41  ;;  %1025 = vmatprep.subr.bf16.mxu0 %v1144_v42 }
  0x4a   :  { %1047 = vmatprep.subr.bf16.mxu1 %v1145_v43  ;;  %717 = vmatprep.mubr.bf16.mxu0 %v904_v8 }
  0x4b   :  { %757 = vmatprep.mubr.bf16.mxu1 %v906_v11 }
  0x4c   :  { %1026 = vmatpush3.bf16.msra.mxu0 %v1146_v44 }
  0x4d   :  { %1048 = vmatpush3.bf16.msra.mxu1 %v1147_v45  ;;  %1027 = vmatprep.subr.bf16.mxu0 %v1148_v46 }
  0x4e   :  { %1049 = vmatprep.subr.bf16.mxu1 %v1149_v47 }
  0x50   :  { %1028 = vmatpush3.bf16.msra.mxu0 %v1150_v48 }
  0x51   :  { %1050 = vmatpush3.bf16.msra.mxu1 %v1151_v49  ;;  %1029 = vmatprep.subr.bf16.mxu0 %v1152_v50 }
  0x52   :  { %1051 = vmatprep.subr.bf16.mxu1 %v1153_v51 }
  0x54   :  { %1030 = vmatpush3.bf16.msra.mxu0 %v1154_v52 }
  0x55   :  { %1052 = vmatpush3.bf16.msra.mxu1 %v1155_v53  ;;  %1031 = vmatprep.subr.bf16.mxu0 %v1156_v54 }
  0x56   :  { %1053 = vmatprep.subr.bf16.mxu1 %v1157_v55 }
  0x58   :  { %1032 = vmatpush3.bf16.msra.mxu0 %v1158_v56 }
  0x59   :  { %1054 = vmatpush3.bf16.msra.mxu1 %v1159_v57  ;;  %1033 = vmatprep.subr.bf16.mxu0 %v1160_v58 }
  0x5a   :  { %1055 = vmatprep.subr.bf16.mxu1 %v1161_v59 }
  0x5c   :  { %1034 = vmatpush3.bf16.msra.mxu0 %v1162_v60 }
  0x5d   :  { %1056 = vmatpush3.bf16.msra.mxu1 %v1163_v61  ;;  %1035 = vmatprep.subr.bf16.mxu0 %v1164_v62 }
  0x5e   :  { %1057 = vmatprep.subr.bf16.mxu1 %v1165_v63 }
  0x60   :  { %1036 = vmatpush3.bf16.msra.mxu0 %v1166_v0 }
  0x61   :  { %1058 = vmatpush3.bf16.msra.mxu1 %v1167_v1  ;;  %1037 = vmatprep.subr.bf16.mxu0 %v1168_v2 }
  0x62   :  { %1059 = vmatprep.subr.bf16.mxu1 %v1169_v3 }
  0x64   :  { %1038 = vmatpush3.bf16.msra.mxu0 %v1170_v4 }
  0x65   :  { %1060 = vmatpush3.bf16.msra.mxu1 %v1171_v5  ;;  %1076 = vmatprep.subr.bf16.mxu0 %v1277_v13 }
  0x67   :  { %718 = vmatmul.mubr.bf16.vlgmr.msra.gmra.mxu0 %v903_v7 }
  0x68   :  { %758 = vmatmul.mubr.bf16.vlgmr.msra.gmra.mxu1 %v905_v10  ;;  %1077 = vmatpush3.bf16.msra.mxu0 %v1176_v12 }
  0x69   :  { %1078 = vmatprep.subr.bf16.mxu0 %v1277_v13  ;;  %1092 = vmatprep.mubr.msk.bf16.mxu0 %vm1278_vm0, %v1277_v13 }
  0x6c   :  { %1079 = vmatpush3.bf16.msra.mxu0 %v1177_v14 }
  0x6d   :  { %1080 = vmatprep.subr.bf16.mxu0 %v1277_v13 }
  0x70   :  { %1081 = vmatpush3.bf16.msra.mxu0 %v1178_v15 }
  0x71   :  { %1082 = vmatprep.subr.bf16.mxu0 %v1277_v13 }
  0x74   :  { %1083 = vmatpush3.bf16.msra.mxu0 %v1179_v16 }
  0x75   :  { %1084 = vmatprep.subr.bf16.mxu0 %v1277_v13 }
  0x78   :  { %1085 = vmatpush3.bf16.msra.mxu0 %v1180_v17 }
  0x79   :  { %1086 = vmatprep.subr.bf16.mxu0 %v1277_v13 }
  0x7c   :  { %1087 = vmatpush3.bf16.msra.mxu0 %v1181_v18 }
  0x7d   :  { %1088 = vmatprep.subr.bf16.mxu0 %v1277_v13 }
  0x80   :  { %1089 = vmatpush3.bf16.msra.mxu0 %v1182_v19 }
  0x81   :  { %1090 = vmatprep.subr.bf16.mxu0 %v1277_v13 }
  0x84   :  { %1091 = vmatpush3.bf16.msra.mxu0 %v1183_v20 }
 0x107   :  { %v995_v21 = vpop.f32.mrf.mxu0 }
 0x108   :  { %v1017_v22 = vpop.f32.mrf.mxu1 }
 0x109   :  { %v996_v23 = vpop.f32.mrf.mxu0 }
 0x10a   :  { %v1018_v24 = vpop.f32.mrf.mxu1  ;;  %v997_v29 = vadd.f32 %v996_v23, %v995_v21 }
 0x10b   :  { %v998_v25 = vpop.f32.mrf.mxu0  ;;  %v1019_v30 = vadd.f32 %v1018_v24, %v1017_v22 }
 0x10c   :  { %v1020_v26 = vpop.f32.mrf.mxu1 }
 0x10d   :  { %v999_v27 = vpop.f32.mrf.mxu0  ;;  %v680_v35 = vadd.f32 %v1019_v30, %v997_v29 }
 0x10e   :  { %v1021_v28 = vpop.f32.mrf.mxu1 }
 0x127   :  { %v1039_v31 = vpop.f32.mrf.mxu0 }
 0x128   :  { %v1061_v32 = vpop.f32.mrf.mxu1 }
 0x129   :  { %v1040_v33 = vpop.f32.mrf.mxu0 }
 0x12a   :  { %v1062_v34 = vpop.f32.mrf.mxu1  ;;  %v1041_v36 = vadd.f32 %v1040_v33, %v1039_v31 }
 0x12b   :  { %v1042_v37 = vpop.f32.mrf.mxu0  ;;  %v1063_v40 = vadd.f32 %v1062_v34, %v1061_v32 }
 0x12c   :  { %v1064_v38 = vpop.f32.mrf.mxu1  ;;  %v720_v39 = vadd.f32 %v1041_v36, %v680_v35 }
 0x12d   :  { %v1043_v41 = vpop.f32.mrf.mxu0 }
 0x12e   :  { %v1065_v42 = vpop.f32.mrf.mxu1  ;;  %v760_v43 = vadd.f32 %v1063_v40, %v720_v39 }
 0x130   :  { %v771_v44 = vmul.f32 %v760_v43, %v760_v43  ;;  %v776_v45 = vpack.c.bf16 %v760_v43, %v760_v43 }
 0x132   :  { %772 = vadd.xlane.f32.xlu0 %v771_v44  ;;  %1093 = vmatmul.mubr.bf16.vlgmr.msra.gmra.mxu0 %v776_v45 }
 0x1bb   :  { %v773_v46 = vpop.xlane.xlu0 %772 }
 0x1bc   :  { %v774_v47 = vmax.f32 %v773_v46, 1e-30 }
 0x1be   :  { %1184 = vrsqrt.f32 %v774_v47 }
 0x1cb   :  { %v1185_v48 = vpop.eup %1184 }
 0x1f2   :  { %v875_v49 = vpop.f32.mrf.mxu0 }
 0x1f3   :  { %v881_v50 = vmul.f32 %v1185_v48, %v875_v49 }
 0x1f4   :  { %v1094_v51 = vpop.f32.mrf.mxu0 }
 0x1f5   :  { %882 = vst [vmem:[#allocation9] sm:$0xff] %v881_v50 }
 0x1f6   :  { %v878_v52 = vpop.f32.mrf.mxu0 }
 0x1f7   :  { %1257 = shalt.err (!%p1254_p5)
}
 0x1f8   :  { %892 = dma.vmem_to_hbm [thread:$0]  %s890_s2, 128, %s1315_s3, [#allocation5]   ;;  %v1095_v53 = vpop.f32.mrf.mxu0 }
 0x1f9   :  { %1270 = dma.done.wait [#allocation5], 128  }
 0x1fa   :  { %1271 = vsyncadd [#allocation5], 4294967168 }
 0x1fb   :  { %896 = vsyncpa [#allocation4], 1 }
 0x1fc   :  { %897 = vsyncpa [#allocation7], 1 }
 0x1fd   :  { %898 = vsyncpa [#allocation5], 1 }

</bundles_post_ra>
